<compile_context>
chip_gen: v6e
topology: v6e:2x2x1
jax: 0.10.0
libtpu: 0.0.40
codegen_flags: <defaults>
</compile_context>

<pallas_src>
import jax
import jax.numpy as jnp
from jax.experimental import pallas as pl
from jax.experimental.pallas import tpu as pltpu


def input_block_kernel(ids_ref, w_ref, pos_ref, o_ref):
    """One grid step over a slab of tile_r lane-dense output rows.

    ids_ref: (tile_r, G*V) int16/int32 -- token id of packed slot q repeated V times and
                                          offset by q*V, so (ids == lane_iota) is the
                                          block one-hot.
    w_ref:   (G*V, G*H)   bfloat16     -- block-diagonal token embedding table.
    pos_ref: (tile_r, G*H) bfloat16    -- positional slab laid out to match o_ref.
    o_ref:   (tile_r, G*H) float32
    """
    lane_iota = jax.lax.broadcasted_iota(jnp.int32, ids_ref.shape, 1)
    # int32 compare on the VPU; cast the bool straight to bf16 for the MXU.
    onehot = (ids_ref[...].astype(jnp.int32) == lane_iota).astype(jnp.bfloat16)
    emb = jnp.dot(onehot, w_ref[...], preferred_element_type=jnp.float32)
    # TODO(synk): training-mode dropout not implemented (eval identity); training parity
    # would use pltpu.prng_seed + pltpu.prng_random_bits per tile to mask/scale here.
    o_ref[...] = emb + pos_ref[...].astype(jnp.float32)


def make_input_block(token_table, positional_table, *, row_tile=1024):
    """Builds the cached kernel parameters and returns a jitted forward(x) -> (S, B, H)."""
    V, H = token_table.shape
    n_pos = positional_table.shape[0]

    # Lane-dense packing factor: G consecutive tokens share one 128-lane output row.
    G = 128 // H if (H < 128 and 128 % H == 0) else 1

    # Cached across calls (review: no per-call kron materialization).  bf16 for the MXU.
    w_blk = jnp.kron(jnp.eye(G, dtype=token_table.dtype), token_table).astype(jnp.bfloat16)
    pos_tab = positional_table.astype(jnp.bfloat16)

    ids_dtype = jnp.int16 if G * V <= 32767 else jnp.int32
    lane_base = (jnp.arange(G, dtype=jnp.int32) * V)[None, :, None]  # (1, G, 1)

    @jax.jit
    def forward(x):
        S, B = x.shape
        N = S * B
        R = pl.cdiv(N, G)                      # packed output rows
        if R <= row_tile:
            tile_r, R_pad = R, R               # single grid step for small configs
        else:
            # NOTE(v7x): choose row_tile so R_pad // row_tile is >= 2 (ideally even) so
            # the "parallel" row axis actually shards across both TensorCores.
            tile_r, R_pad = row_tile, pl.cdiv(R, row_tile) * row_tile
        N_pad = R_pad * G
        grid = (R_pad // tile_r,)

        # ---- wrapper-side layout plumbing (inside the same jit) ----
        flat_ids = jnp.pad(x.reshape(N).astype(jnp.int32), (0, N_pad - N))
        ids_off = (jnp.broadcast_to(flat_ids.reshape(R_pad, G, 1), (R_pad, G, V))
                   + lane_base).reshape(R_pad, G * V).astype(ids_dtype)

        pos_idx = jnp.minimum(jnp.arange(N_pad, dtype=jnp.int32) // B, n_pos - 1)
        pos_slab = pos_tab[pos_idx].reshape(R_pad, G * H)      # bf16, matches o_ref layout

        out_slab = pl.pallas_call(
            input_block_kernel,
            out_shape=jax.ShapeDtypeStruct((R_pad, G * H), jnp.float32),
            grid=grid,
            in_specs=[
                pl.BlockSpec((tile_r, G * V), lambda i: (i, 0)),  # narrow ids, lane-major
                pl.BlockSpec((G * V, G * H), lambda i: (0, 0)),   # table resident each step
                pl.BlockSpec((tile_r, G * H), lambda i: (i, 0)),  # bf16 positional slab
            ],
            out_specs=pl.BlockSpec((tile_r, G * H), lambda i: (i, 0)),
            compiler_params=pltpu.CompilerParams(
                dimension_semantics=("parallel",),
                vmem_limit_bytes=32 * 1024 * 1024,  # ~2.7 MiB used at row_tile=1024
            ),
        )(ids_off, w_blk, pos_slab)

        # (R_pad, G*H) row-major == (N_pad, H) row-major; drop padding -> (S, B, H).
        return out_slab.reshape(N_pad, H)[:N].reshape(S, B, H)

    return forward


if __name__ == "__main__":
    # Small config consistent with the module:
    #   n_champs=64, hidden_dim=32, n_positions=6, seq=6 (<= n_positions), batch=8
    n_champs, hidden_dim, n_positions = 64, 32, 6
    S, B = 6, 8

    key = jax.random.PRNGKey(0)
    k_tok, k_pos, k_x = jax.random.split(key, 3)

    # nn.Embedding default init: N(0, 1)
    token_table = jax.random.normal(k_tok, (n_champs, hidden_dim), dtype=jnp.float32)
    positional_table = jax.random.normal(k_pos, (n_positions, hidden_dim), dtype=jnp.float32)
    x = jax.random.randint(k_x, (S, B), 0, n_champs, dtype=jnp.int32)

    forward = make_input_block(token_table, positional_table)
    out = jax.block_until_ready(forward(x))

    # Pure-JAX references (eval-mode dropout == identity).
    pos = jnp.broadcast_to(jnp.arange(S)[:, None], (S, B))
    tok_bf = token_table.astype(jnp.bfloat16).astype(jnp.float32)
    pos_bf = positional_table.astype(jnp.bfloat16).astype(jnp.float32)
    ref_bf16 = tok_bf[x] + pos_bf[pos]            # kernel uses bf16 tables -> exact match
    ref_f32 = token_table[x] + positional_table[pos]

    assert out.shape == (S, B, hidden_dim)
    assert jnp.allclose(out, ref_bf16, atol=1e-5, rtol=1e-5), "mismatch vs bf16-table reference"
    assert jnp.allclose(out, ref_f32, atol=3e-2, rtol=2e-2), "mismatch vs f32 reference"

    print("KERNEL_OK")
</pallas_src>

<mosaic_0001>
module attributes {stable_mosaic.version = 11 : i64} {
  func.func @input_block_kernel(%arg0: i32, %arg1: memref<12x256xi16, #tpu.memory_space<vmem>>, %arg2: memref<256x128xbf16, #tpu.memory_space<vmem>>, %arg3: memref<12x128xbf16, #tpu.memory_space<vmem>>, %arg4: memref<12x128xf32, #tpu.memory_space<vmem>>) attributes {dimension_semantics = [#tpu.dimension_semantics<parallel>], iteration_bounds = array<i64: 1>, scalar_prefetch = 0 : i64, scratch_operands = 0 : i64, tpu.core_type = #tpu.core_type<tc>, window_params = [{transform_indices = @transform_0, window_bounds = array<i64: 12, 256>}, {pipeline_mode = #tpu.pipeline_mode<synchronous>, transform_indices = @transform_1, window_bounds = array<i64: 256, 128>}, {transform_indices = @transform_2, window_bounds = array<i64: 12, 128>}, {transform_indices = @transform_3, window_bounds = array<i64: 12, 128>}]} {
    %0 = tpu.iota {dimensions = array<i32: 1>} : vector<12x256xi32>
    %c0 = arith.constant 0 : index
    %c0_0 = arith.constant 0 : index
    %1 = vector.load %arg1[%c0, %c0_0] : memref<12x256xi16, #tpu.memory_space<vmem>>, vector<12x256xi16>
    %2 = arith.extsi %1 : vector<12x256xi16> to vector<12x256xi32>
    %3 = arith.cmpi eq, %2, %0 : vector<12x256xi32>
    %4 = arith.extui %3 : vector<12x256xi1> to vector<12x256xi32>
    %5 = arith.sitofp %4 : vector<12x256xi32> to vector<12x256xf32>
    %6 = arith.truncf %5 : vector<12x256xf32> to vector<12x256xbf16>
    %c0_1 = arith.constant 0 : index
    %c0_2 = arith.constant 0 : index
    %7 = vector.load %arg2[%c0_1, %c0_2] : memref<256x128xbf16, #tpu.memory_space<vmem>>, vector<256x128xbf16>
    %cst = arith.constant dense<0.000000e+00> : vector<12x128xf32>
    %8 = tpu.matmul %6, %7, %cst {dimension_numbers = #tpu.dot_dimension_numbers<[1], [0], [0], [1], [0, 0, 1, 1], [], []>} : vector<12x256xbf16>, vector<256x128xbf16>, vector<12x128xf32> -> vector<12x128xf32>
    %c0_3 = arith.constant 0 : index
    %c0_4 = arith.constant 0 : index
    %9 = vector.load %arg3[%c0_3, %c0_4] : memref<12x128xbf16, #tpu.memory_space<vmem>>, vector<12x128xbf16>
    %10 = arith.extf %9 : vector<12x128xbf16> to vector<12x128xf32>
    %11 = arith.addf %8, %10 : vector<12x128xf32>
    %c0_5 = arith.constant 0 : index
    %c0_6 = arith.constant 0 : index
    %12 = vector.load %arg4[%c0_5, %c0_6] : memref<12x128xf32, #tpu.memory_space<vmem>>, vector<12x128xf32>
    tpu.vector_store %arg4[%c0_5, %c0_6], %11 {strides = array<i32>} : memref<12x128xf32, #tpu.memory_space<vmem>>, vector<12x128xf32>,
    return
  }
  func.func @transform_0(%arg0: i32) -> (i32, i32) {
    %c0_i32 = arith.constant 0 : i32
    %c0_i32_0 = arith.constant 0 : i32
    return %arg0, %c0_i32 : i32, i32
  }
  func.func @transform_1(%arg0: i32) -> (i32, i32) {
    %c0_i32 = arith.constant 0 : i32
    %c0_i32_0 = arith.constant 0 : i32
    %c0_i32_1 = arith.constant 0 : i32
    return %c0_i32, %c0_i32_0 : i32, i32
  }
  func.func @transform_2(%arg0: i32) -> (i32, i32) {
    %c0_i32 = arith.constant 0 : i32
    %c0_i32_0 = arith.constant 0 : i32
    return %arg0, %c0_i32 : i32, i32
  }
  func.func @transform_3(%arg0: i32) -> (i32, i32) {
    %c0_i32 = arith.constant 0 : i32
    %c0_i32_0 = arith.constant 0 : i32
    return %arg0, %c0_i32 : i32, i32
  }
}

</mosaic_0001>

<bundles_post_ra>
// kernel: forward.1
= control target key start
LH: loop header
LB: loop body
LE: loop exit
PB: predicated region body
PF: predicated region fallthrough
CT: control target
= control target key end

     0   :  { %v15_v6 = vlaneseq  ;;  %v280_v20 = vmov 1.0|1.0   ;;  %s367_s1 = inlined_call_operand.vmem [shape: bf16[256,128], index: 1, kind: input, shape index: {}]   ;;  %s368_s0 = inlined_call_operand.vmem [shape: s16[12,256], index: 0, kind: input, shape index: {}]   ;;  %s369_s2 = inlined_call_operand.vmem [shape: bf16[12,128], index: 2, kind: input, shape index: {}]   ;;  %s370_s3 = inlined_call_operand.vmem [shape: f32[12,128], index: 3, kind: output, shape index: {}]  }
   0x1   :  { %v264_v0 = vld [vmem:[%s367_s1 + $0x78] sm:$0xff]   ;;  %v266_v2 = vld [vmem:[%s367_s1 + $0x70] sm:$0xff]   ;;  %v268_v4 = vld [vmem:[%s367_s1 + $0x68] sm:$0xff]  }
   0x2   :  { %v265_v1 = vld [vmem:[%s367_s1 + $0x38] sm:$0xff]   ;;  %241 = vmatprep.subr.bf16.mxu0 %v264_v0  ;;  %v267_v3 = vld [vmem:[%s367_s1 + $0x30] sm:$0xff]   ;;  %v269_v5 = vld [vmem:[%s367_s1 + $0x28] sm:$0xff]   ;;  %v16_v9 = vand.u32 127, %v15_v6 }
   0x3   :  { %242 = vmatpush3.bf16.msra.mxu0 %v265_v1  ;;  %v270_v7 = vld [vmem:[%s367_s1 + $0x60] sm:$0xff]   ;;  %v272_v10 = vld [vmem:[%s367_s1 + $0x58] sm:$0xff]   ;;  %v274_v13 = vld [vmem:[%s367_s1 + $0x50] sm:$0xff]  }
   0x4   :  { %243 = vmatprep.subr.bf16.mxu0 %v266_v2  ;;  %v271_v8 = vld [vmem:[%s367_s1 + $0x20] sm:$0xff]   ;;  %v273_v11 = vld [vmem:[%s367_s1 + $0x18] sm:$0xff]   ;;  %v17_v12 = vadd.s32 128, %v16_v9  ;;  %v19_v15 = vld [vmem:[%s368_s0 + $0x8] sm:$0x33] }
   0x5   :  { %v18_v14 = vld [vmem:[%s368_s0] sm:$0xff]  ;;  %v23_v17 = vunpack.c.h.b16 %v19_v15  ;;  %v275_v18 = vld [vmem:[%s367_s1 + $0x10] sm:$0xff]   ;;  %v276_v19 = vld [vmem:[%s367_s1 + $0x48] sm:$0xff]   ;;  %v22_v24 = vunpack.c.l.b16 %v19_v15 }
   0x6   :  { %v21_v16 = vunpack.c.h.b16 %v18_v14  ;;  %v277_v21 = vld [vmem:[%s367_s1 + $0x8] sm:$0xff]   ;;  %v278_v22 = vld [vmem:[%s367_s1 + $0x40] sm:$0xff]   ;;  %v20_v23 = vunpack.c.l.b16 %v18_v14 }
   0x7   :  { %244 = vmatpush3.bf16.msra.mxu0 %v267_v3  ;;  %vm27_vm1 = vcmp.eq.s32.totalorder %v23_v17, %v17_v12  ;;  %v279_v25 = vld [vmem:[%s367_s1] sm:$0xff]   ;;  %vm26_vm4 = vcmp.eq.s32.totalorder %v22_v24, %v16_v9 }
   0x8   :  { %245 = vmatprep.subr.bf16.mxu0 %v268_v4  ;;  %vm25_vm0 = vcmp.eq.s32.totalorder %v21_v16, %v17_v12  ;;  %vm24_vm3 = vcmp.eq.s32.totalorder %v20_v23, %v16_v9  ;;  %v70_v26 = vld [vmem:[%s369_s2] sm:$0xf]  ;;  %v71_v30 = vld [vmem:[%s369_s2 + $0x4] sm:$0x3] }
   0x9   :  { %vm237_vm2 = vmpackc.low %vm27_vm1, %vm25_vm0  ;;  %v72_v28 = vunpack.c.l.bf16 %v70_v26  ;;  %v73_v34 = vunpack.c.l.bf16 %v71_v30 }
   0xa   :  { %238 = vmatprep.mubr.msk.bf16.mxu0 %vm237_vm2, %v280_v20  ;;  %vm239_vm5 = vmpackc.low %vm26_vm4, %vm24_vm3 }
   0xb   :  { %246 = vmatpush3.bf16.msra.mxu0 %v269_v5 }
   0xc   :  { %247 = vmatprep.subr.bf16.mxu0 %v270_v7 }
   0xf   :  { %248 = vmatpush3.bf16.msra.mxu0 %v271_v8 }
  0x10   :  { %249 = vmatprep.subr.bf16.mxu0 %v272_v10 }
  0x13   :  { %250 = vmatpush3.bf16.msra.mxu0 %v273_v11 }
  0x14   :  { %251 = vmatprep.subr.bf16.mxu0 %v274_v13 }
  0x17   :  { %252 = vmatpush3.bf16.msra.mxu0 %v275_v18 }
  0x18   :  { %253 = vmatprep.subr.bf16.mxu0 %v276_v19 }
  0x1b   :  { %254 = vmatpush3.bf16.msra.mxu0 %v277_v21 }
  0x1c   :  { %255 = vmatprep.subr.bf16.mxu0 %v278_v22 }
  0x1f   :  { %256 = vmatpush3.bf16.msra.mxu0 %v279_v25 }
  0x22   :  { %240 = vmatmul.mubr.msk.bf16.vlgmr.msra.gmra.mxu0 %vm239_vm5, %v280_v20 }
  0xe2   :  { %v257_v27 = vpop.f32.mrf.mxu0 }
  0xe4   :  { %v258_v29 = vpop.f32.mrf.mxu0 }
  0xe5   :  { %v259_v31 = vadd.f32 %v258_v29, %v257_v27 }
  0xe6   :  { %v260_v32 = vpop.f32.mrf.mxu0 }
  0xe7   :  { %v205_v33 = vadd.f32 %v259_v31, %v72_v28 }
  0xe8   :  { %v261_v35 = vpop.f32.mrf.mxu0 }
  0xe9   :  { %211 = vst [vmem:[%s370_s3] sm:$0xff] %v205_v33  ;;  %v262_v36 = vadd.f32 %v261_v35, %v260_v32 }
  0xeb   :  { %v208_v37 = vadd.f32 %v262_v36, %v73_v34 }
  0xed   :  { %212 = vst [vmem:[%s370_s3 + $0x8] sm:$0xf] %v208_v37 }

</bundles_post_ra>
